<compile_context>
chip_gen: v5e
topology: v5e:2x2
jax: 0.10.0
libtpu: 0.0.40
codegen_flags: <defaults>
</compile_context>

<pallas_src>
import jax
import jax.numpy as jnp
from jax.experimental import pallas as pl
from jax.experimental.pallas import tpu as pltpu


def _round_up(x: int, m: int) -> int:
    return (x + m - 1) // m * m


def _vmem_limit_bytes(want_bytes: int) -> int:
    """Chip-aware VMEM budget: min(requested, capacity - headroom)."""
    cap = 64 << 20  # conservative fallback = v7x per-TensorCore VMEM
    try:
        info = pltpu.get_tpu_info()
        cap = int(getattr(info, "vmem_capacity_bytes", cap) or cap)
    except Exception:
        pass
    usable = max(cap - (12 << 20), 16 << 20)   # leave headroom for Mosaic scratch
    return int(min(max(want_bytes, 16 << 20), usable))


def mlp_kernel(x_ref, w1_ref, b1_ref, w2_ref, b2_ref, out_ref):
    # x:  (TB, D_in) f32   w1: (D_in, H_pad) bf16   b1: (1, H_pad) f32
    # w2: (H_pad, C_pad) bf16   b2: (1, C_pad) f32   out: (TB, C_pad) f32
    x = x_ref[...].astype(w1_ref.dtype)                 # bf16 feed to the MXU
    h = jnp.dot(x, w1_ref[...], preferred_element_type=jnp.float32)
    h = jnp.maximum(h + b1_ref[...], 0.0)               # f32 bias + ReLU epilogue
    y = jnp.dot(h.astype(w2_ref.dtype), w2_ref[...],
                preferred_element_type=jnp.float32)
    out_ref[...] = (y + b2_ref[...]).astype(out_ref.dtype)


def prepare_mlp_params(w1, b1, w2, b2, *, matmul_dtype=jnp.bfloat16):
    """One-time parameter prep (hoisted out of the per-call forward path).

    Weights are (in_features, out_features), transposed vs. torch.nn.Linear.
    H and C are zero-padded to multiples of 128 (lane-dense intermediate and
    output; zeros are exact through ReLU and the second matmul). Weights are
    cast to `matmul_dtype` (bf16 by default) for native-rate MXU; biases stay
    f32 for the f32 epilogue.
    """
    D_in, H = w1.shape
    H2, C = w2.shape
    assert H2 == H, "w1/w2 hidden dims mismatch"
    H_pad = _round_up(H, 128)
    C_pad = _round_up(C, 128)
    w1p = jnp.pad(w1, ((0, 0), (0, H_pad - H))).astype(matmul_dtype)
    b1p = jnp.pad(b1.reshape(1, H), ((0, 0), (0, H_pad - H))).astype(jnp.float32)
    w2p = jnp.pad(w2, ((0, H_pad - H), (0, C_pad - C))).astype(matmul_dtype)
    b2p = jnp.pad(b2.reshape(1, C), ((0, 0), (0, C_pad - C))).astype(jnp.float32)
    return {"w1": w1p, "b1": b1p, "w2": w2p, "b2": b2p, "num_classes": C}


def mlp_classifier(x, params, *, block_b: int = 512):
    """Fused MLP forward: relu(x @ w1 + b1) @ w2 + b2, batch-tiled."""
    w1, b1, w2, b2 = params["w1"], params["b1"], params["w2"], params["b2"]
    C = params["num_classes"]
    B, D_in = x.shape
    assert w1.shape[0] == D_in, "input_dim mismatch"
    H_pad = w1.shape[1]
    C_pad = w2.shape[1]

    # --- Batch tiling (no wrapper padding of x) -----------------------------
    block_b = max(8, _round_up(block_b, 8))
    if B <= block_b:
        TB = B                      # full-dim block: always a legal block shape
    else:
        TB = block_b                # multiple of 8; final block is ragged/masked
    # v7x megacore: give the ("parallel",) batch axis >= 2 steps when the
    # batch is big enough to split at MXU-friendly (256-row) granularity.
    if B >= 512 and pl.cdiv(B, TB) < 2:
        TB = _round_up(pl.cdiv(B, 2), 256)
    grid = (pl.cdiv(B, TB),)

    # --- VMEM budget: double-buffered residents + double-buffered x/out -----
    wt_item = jnp.dtype(w1.dtype).itemsize
    x_item = jnp.dtype(x.dtype).itemsize
    resident = (D_in * H_pad + H_pad * C_pad) * wt_item + (H_pad + C_pad) * 4
    streamed = TB * D_in * x_item + TB * C_pad * 4
    vmem_bytes = _vmem_limit_bytes(2 * resident + 2 * streamed + (4 << 20))
    # TODO(synk): for weights too large to stay resident (hits first on v7x's
    # 64 MiB VMEM), add an H-tiled accumulator path (second "arbitrary" grid
    # axis over hidden tiles with a (TB, C_pad) f32 scratch) and/or
    # single-buffer the constant-index weight specs.

    cost = pl.CostEstimate(
        flops=2 * B * (D_in * H_pad + H_pad * C_pad),
        transcendentals=0,
        bytes_accessed=(B * D_in * x_item
                        + (D_in * H_pad + H_pad * C_pad) * wt_item
                        + (H_pad + C_pad) * 4
                        + B * C_pad * 4),
    )

    out = pl.pallas_call(
        mlp_kernel,
        out_shape=jax.ShapeDtypeStruct((B, C_pad), x.dtype),
        grid_spec=pltpu.PrefetchScalarGridSpec(
            num_scalar_prefetch=0,
            grid=grid,
            in_specs=[
                pl.BlockSpec((TB, D_in), lambda i: (i, 0)),      # x: streamed per tile
                pl.BlockSpec((D_in, H_pad), lambda i: (0, 0)),   # w1: resident
                pl.BlockSpec((1, H_pad), lambda i: (0, 0)),      # b1: resident
                pl.BlockSpec((H_pad, C_pad), lambda i: (0, 0)),  # w2: resident
                pl.BlockSpec((1, C_pad), lambda i: (0, 0)),      # b2: resident
            ],
            out_specs=pl.BlockSpec((TB, C_pad), lambda i: (i, 0)),
        ),
        compiler_params=pltpu.CompilerParams(
            dimension_semantics=("parallel",),   # batch tiles shard across TCs (v7x)
            vmem_limit_bytes=vmem_bytes,
        ),
        cost_estimate=cost,
    )(x, w1, b1, w2, b2)

    # Strip only the lane-padding of the class dim (batch was never padded).
    return out[:, :C]


if __name__ == "__main__":
    # Shapes implied by MLPClassifier(input_dim, hidden_dim, num_classes)
    batch, input_dim, hidden_dim, num_classes = 4, 32, 32, 8

    key = jax.random.PRNGKey(0)
    kx, kw1, kb1, kw2, kb2 = jax.random.split(key, 5)

    x = jax.random.normal(kx, (batch, input_dim), dtype=jnp.float32)

    # PyTorch stores Linear weights as (out, in); we keep them as (in, out)
    # so the kernel does x @ W directly.
    w1 = jax.random.normal(kw1, (input_dim, hidden_dim), dtype=jnp.float32) * 0.1
    b1 = jax.random.normal(kb1, (hidden_dim,), dtype=jnp.float32) * 0.1
    w2 = jax.random.normal(kw2, (hidden_dim, num_classes), dtype=jnp.float32) * 0.1
    b2 = jax.random.normal(kb2, (num_classes,), dtype=jnp.float32) * 0.1

    params = prepare_mlp_params(w1, b1, w2, b2)   # one-time pad + bf16 cast
    out = mlp_classifier(x, params)
    out = jax.block_until_ready(out)

    # Reference in plain JAX f32 (same semantics as the PyTorch forward).
    # Kernel feeds the MXU in bf16 with f32 accumulation, so use a
    # bf16-appropriate tolerance.
    ref = jnp.maximum(x @ w1 + b1, 0.0) @ w2 + b2
    assert out.shape == (batch, num_classes)
    assert jnp.allclose(out, ref, atol=2e-2, rtol=2e-2), \
        float(jnp.max(jnp.abs(out - ref)))

    print("KERNEL_OK")
</pallas_src>

<mosaic_0001>
module attributes {stable_mosaic.version = 11 : i64} {
  func.func @mlp_kernel(%arg0: i32, %arg1: memref<4x32xf32, #tpu.memory_space<vmem>>, %arg2: memref<32x128xbf16, #tpu.memory_space<vmem>>, %arg3: memref<1x128xf32, #tpu.memory_space<vmem>>, %arg4: memref<128x128xbf16, #tpu.memory_space<vmem>>, %arg5: memref<1x128xf32, #tpu.memory_space<vmem>>, %arg6: memref<4x128xf32, #tpu.memory_space<vmem>>) attributes {dimension_semantics = [#tpu.dimension_semantics<parallel>], iteration_bounds = array<i64: 1>, scalar_prefetch = 0 : i64, scratch_operands = 0 : i64, tpu.core_type = #tpu.core_type<tc>, window_params = [{transform_indices = @transform_0, window_bounds = array<i64: 4, 32>}, {pipeline_mode = #tpu.pipeline_mode<synchronous>, transform_indices = @transform_1, window_bounds = array<i64: 32, 128>}, {pipeline_mode = #tpu.pipeline_mode<synchronous>, transform_indices = @transform_2, window_bounds = array<i64: 1, 128>}, {pipeline_mode = #tpu.pipeline_mode<synchronous>, transform_indices = @transform_3, window_bounds = array<i64: 128, 128>}, {pipeline_mode = #tpu.pipeline_mode<synchronous>, transform_indices = @transform_4, window_bounds = array<i64: 1, 128>}, {transform_indices = @transform_5, window_bounds = array<i64: 4, 128>}]} {
    %c0 = arith.constant 0 : index
    %c0_0 = arith.constant 0 : index
    %0 = vector.load %arg1[%c0, %c0_0] : memref<4x32xf32, #tpu.memory_space<vmem>>, vector<4x32xf32>
    %1 = arith.truncf %0 : vector<4x32xf32> to vector<4x32xbf16>
    %c0_1 = arith.constant 0 : index
    %c0_2 = arith.constant 0 : index
    %2 = vector.load %arg2[%c0_1, %c0_2] : memref<32x128xbf16, #tpu.memory_space<vmem>>, vector<32x128xbf16>
    %cst = arith.constant dense<0.000000e+00> : vector<4x128xf32>
    %3 = tpu.matmul %1, %2, %cst {dimension_numbers = #tpu.dot_dimension_numbers<[1], [0], [0], [1], [0, 0, 1, 1], [], []>} : vector<4x32xbf16>, vector<32x128xbf16>, vector<4x128xf32> -> vector<4x128xf32>
    %c0_3 = arith.constant 0 : index
    %c0_4 = arith.constant 0 : index
    %4 = vector.load %arg3[%c0_3, %c0_4] : memref<1x128xf32, #tpu.memory_space<vmem>>, vector<1x128xf32>
    %5 = vector.broadcast %4 : vector<1x128xf32> to vector<4x128xf32>
    %6 = arith.addf %3, %5 : vector<4x128xf32>
    %cst_5 = arith.constant 0.000000e+00 : f32
    %7 = vector.broadcast %cst_5 : f32 to vector<4x128xf32>
    %8 = arith.maximumf %6, %7 : vector<4x128xf32>
    %9 = arith.truncf %8 : vector<4x128xf32> to vector<4x128xbf16>
    %c0_6 = arith.constant 0 : index
    %c0_7 = arith.constant 0 : index
    %10 = vector.load %arg4[%c0_6, %c0_7] : memref<128x128xbf16, #tpu.memory_space<vmem>>, vector<128x128xbf16>
    %cst_8 = arith.constant dense<0.000000e+00> : vector<4x128xf32>
    %11 = tpu.matmul %9, %10, %cst_8 {dimension_numbers = #tpu.dot_dimension_numbers<[1], [0], [0], [1], [0, 0, 1, 1], [], []>} : vector<4x128xbf16>, vector<128x128xbf16>, vector<4x128xf32> -> vector<4x128xf32>
    %c0_9 = arith.constant 0 : index
    %c0_10 = arith.constant 0 : index
    %12 = vector.load %arg5[%c0_9, %c0_10] : memref<1x128xf32, #tpu.memory_space<vmem>>, vector<1x128xf32>
    %13 = vector.broadcast %12 : vector<1x128xf32> to vector<4x128xf32>
    %14 = arith.addf %11, %13 : vector<4x128xf32>
    %c0_11 = arith.constant 0 : index
    %c0_12 = arith.constant 0 : index
    %15 = vector.load %arg6[%c0_11, %c0_12] : memref<4x128xf32, #tpu.memory_space<vmem>>, vector<4x128xf32>
    tpu.vector_store %arg6[%c0_11, %c0_12], %14 {strides = array<i32>} : memref<4x128xf32, #tpu.memory_space<vmem>>, vector<4x128xf32>,
    return
  }
  func.func @transform_0(%arg0: i32) -> (i32, i32) {
    %c0_i32 = arith.constant 0 : i32
    %c0_i32_0 = arith.constant 0 : i32
    return %arg0, %c0_i32 : i32, i32
  }
  func.func @transform_1(%arg0: i32) -> (i32, i32) {
    %c0_i32 = arith.constant 0 : i32
    %c0_i32_0 = arith.constant 0 : i32
    %c0_i32_1 = arith.constant 0 : i32
    return %c0_i32, %c0_i32_0 : i32, i32
  }
  func.func @transform_2(%arg0: i32) -> (i32, i32) {
    %c0_i32 = arith.constant 0 : i32
    %c0_i32_0 = arith.constant 0 : i32
    %c0_i32_1 = arith.constant 0 : i32
    return %c0_i32, %c0_i32_0 : i32, i32
  }
  func.func @transform_3(%arg0: i32) -> (i32, i32) {
    %c0_i32 = arith.constant 0 : i32
    %c0_i32_0 = arith.constant 0 : i32
    %c0_i32_1 = arith.constant 0 : i32
    return %c0_i32, %c0_i32_0 : i32, i32
  }
  func.func @transform_4(%arg0: i32) -> (i32, i32) {
    %c0_i32 = arith.constant 0 : i32
    %c0_i32_0 = arith.constant 0 : i32
    %c0_i32_1 = arith.constant 0 : i32
    return %c0_i32, %c0_i32_0 : i32, i32
  }
  func.func @transform_5(%arg0: i32) -> (i32, i32) {
    %c0_i32 = arith.constant 0 : i32
    %c0_i32_0 = arith.constant 0 : i32
    return %arg0, %c0_i32 : i32, i32
  }
}

</mosaic_0001>

<bundles_post_ra>
// kernel: tpu_custom_call.1
= control target key start
LH: loop header
LB: loop body
LE: loop exit
PB: predicated region body
PF: predicated region fallthrough
CT: control target
= control target key end

     0   :  { %10 = vsyncpa [#allocation3], 0  ;;  %s423_s0 = inlined_call_operand.hbm [shape: f32[4,32], index: 0, kind: input, shape index: {}]   ;;  %s424_s1 = inlined_call_operand.hbm [shape: bf16[32,128], index: 1, kind: input, shape index: {}]   ;;  %s425_s2 = inlined_call_operand.vmem [shape: f32[1,128], index: 2, kind: input, shape index: {}]   ;;  %s426_s3 = inlined_call_operand.hbm [shape: bf16[128,128], index: 3, kind: input, shape index: {}]   ;;  %s427_s4 = inlined_call_operand.vmem [shape: f32[1,128], index: 4, kind: input, shape index: {}]   ;;  %s428_s5 = inlined_call_operand.hbm [shape: f32[4,128], index: 5, kind: output, shape index: {}]  }
   0x1   :  { %11 = vsyncpa [#allocation6], 0  ;;  %s28_s20 = sshll.u32 %s424_s1, 4  ;;  %s29_s20 = int_to_ptr.hbm [resolvable:$true] %s28_s20 }
   0x2   :  { %12 = vsyncpa [#allocation4], 0  ;;  %s369_s21 = smov [#allocation5]   ;;  %s18_s25 = sshll.u32 %s423_s0, 4  ;;  %s19_s25 = int_to_ptr.hbm [resolvable:$true] %s18_s25 }
   0x3   :  { %s30_s22 = sshll.u32 %s369_s21, 4  ;;  %s370_s26 = smov 64   ;;  %s31_s22 = int_to_ptr.vmem [resolvable:$true] %s30_s22 }
   0x4   :  { %s371_s27 = smov 4   ;;  %s372_s28 = smov [#allocation2]  }
   0x5   :  { %36 = dma.hbm_to_vmem [thread:$0]  %s29_s20, 256, %s31_s22, [#allocation6], %s370_s26, %s370_s26, %s371_s27  }
   0x6   :  { %s20_s29 = sshll.u32 %s372_s28, 4  ;;  %s43_s7 = sshll.u32 %s426_s3, 4  ;;  %s21_s29 = int_to_ptr.vmem [resolvable:$true] %s20_s29  ;;  %s44_s7 = int_to_ptr.hbm [resolvable:$true] %s43_s7 }
   0x7   :  { %23 = dma.hbm_to_vmem [thread:$0]  %s19_s25, 64, %s21_s29, [#allocation3]  }
   0x8   :  { %s373_s1 = smov [#allocation7]  }
   0x9   :  { %s45_s8 = sshll.u32 %s373_s1, 4  ;;  %s46_s8 = int_to_ptr.vmem [resolvable:$true] %s45_s8 }
   0xa   :  { %51 = dma.hbm_to_vmem [thread:$0]  %s44_s7, 1024, %s46_s8, [#allocation6], %s370_s26, %s370_s26, %s371_s27  }
   0xb   :  { %363 = dma.done.wait [#allocation3], 64  }
   0xc   :  { %364 = vsyncadd [#allocation3], 4294967232 }
   0xd   :  { %365 = dma.done.wait [#allocation6], 1280  }
   0xe   :  { %366 = vsyncadd [#allocation6], 4294966016  ;;  %v250_v0 = vld [vmem:[#allocation5 + $0x8] sm:$0xff]  ;;  %v249_v2 = vld [vmem:[#allocation5] sm:$0xff]  ;;  %vm89_vm0 = vcmask 261120   ;;  %s374_s11 = smov [#allocation8]  }
   0xf   :  { %v258_v1 = vld [vmem:[#allocation7 + $0x38] sm:$0xff]  ;;  %99 = vmatpush.bf16.msra.mxu0 %v250_v0  ;;  %v67_v3 = vld [vmem:[#allocation2] sm:$0xf]  ;;  %v257_v4 = vld [vmem:[#allocation7 + $0x30] sm:$0xff]  ;;  %s195_s12 = sshll.u32 %s374_s11, 4  ;;  %s197_s15 = sshll.u32 %s428_s5, 4  ;;  %s196_s12 = int_to_ptr.vmem [resolvable:$true] %s195_s12  ;;  %s198_s15 = int_to_ptr.hbm [resolvable:$true] %s197_s15 }
  0x10   :  { %176 = vmatpush.bf16.msra.mxu1 %v258_v1  ;;  %v68_v5 = vpack.c.bf16 %v67_v3, %v67_v3  ;;  %v256_v6 = vld [vmem:[#allocation7 + $0x28] sm:$0xff]  ;;  %v255_v7 = vld [vmem:[#allocation7 + $0x20] sm:$0xff]  ;;  %v254_v8 = vld [vmem:[#allocation7 + $0x18] sm:$0xff] }
  0x11   :  { %v253_v9 = vld [vmem:[#allocation7 + $0x10] sm:$0xff]  ;;  %v252_v10 = vld [vmem:[#allocation7 + $0x8] sm:$0xff]  ;;  %v251_v11 = vld [vmem:[#allocation7] sm:$0xff] }
  0x12   :  { %v265_v12 = vld [vmem:[%s425_s2] ss:$0 sm:$0xff] }
  0x13   :  { %100 = vmatpush.bf16.msra.mxu0 %v249_v2  ;;  %v266_v18 = vld [vmem:[%s427_s4] ss:$0 sm:$0xff] }
  0x14   :  { %177 = vmatpush.bf16.msra.mxu1 %v257_v4 }
  0x16   :  { %216 = vmatmul.msk.bf16.vlgmr.msra.gmra.mxu0 %vm89_vm0, %v68_v5 }
  0x18   :  { %178 = vmatpush.bf16.msra.mxu1 %v256_v6 }
  0x1c   :  { %179 = vmatpush.bf16.msra.mxu1 %v255_v7 }
  0x20   :  { %180 = vmatpush.bf16.msra.mxu1 %v254_v8 }
  0x24   :  { %181 = vmatpush.bf16.msra.mxu1 %v253_v9 }
  0x28   :  { %182 = vmatpush.bf16.msra.mxu1 %v252_v10 }
  0x2c   :  { %183 = vmatpush.bf16.msra.mxu1 %v251_v11 }
  0x93   :  { %v102_v13 = vpop.f32.mrf.mxu0 }
  0x94   :  { %v103_v14 = vadd.f32 %v265_v12, %v102_v13 }
  0x96   :  { %v106_v15 = vmax.f32 %v103_v14, 0.0 }
  0x98   :  { %v107_v16 = vpack.c.bf16 %v106_v15, %v106_v15 }
  0x9a   :  { %184 = vmatmul.bf16.vlgmr.msra.gmra.mxu1 %v107_v16 }
  0x9b   :  { %v104_v17 = vpop.f32.mrf.mxu0 }
 0x117   :  { %v185_v19 = vpop.f32.mrf.mxu1 }
 0x118   :  { %v186_v20 = vadd.f32 %v266_v18, %v185_v19 }
 0x11a   :  { %189 = vst [vmem:[#allocation8] sm:$0xf] %v186_v20 }
 0x11b   :  { %200 = dma.vmem_to_hbm [thread:$0]  %s196_s12, 64, %s198_s15, [#allocation4]  }
 0x11f   :  { %v187_v21 = vpop.f32.mrf.mxu1 }
 0x120   :  { %367 = dma.done.wait [#allocation4], 64  }
 0x121   :  { %368 = vsyncadd [#allocation4], 4294967232 }
 0x122   :  { %205 = vsyncpa [#allocation3], 1 }
 0x123   :  { %206 = vsyncpa [#allocation6], 1 }
 0x124   :  { %207 = vsyncpa [#allocation4], 1 }

</bundles_post_ra>
